<compile_context>
chip_gen: v7x
topology: tpu7x:2x2x1
jax: 0.10.0
libtpu: 0.0.40
codegen_flags: <defaults>
</compile_context>

<pallas_src>
from functools import partial

import jax
import jax.numpy as jnp
from jax.experimental import pallas as pl
from jax.experimental.pallas import tpu as pltpu

HEIGHT = 4
WIDTH = 4
NUM_OBJECTS = 7
N_ACTIONS = 4

INPUT_SIZE = WIDTH * HEIGHT * NUM_OBJECTS   # 112 (multiple of 8; full last dim)
HIDDEN1 = 100
HIDDEN2 = 100

H_PAD = 128      # hidden dims padded to one full lane width
OUT_PAD = 128    # lane-dense output block; wrapper slices back to N_ACTIONS


def _round_up(n, m):
    return ((n + m - 1) // m) * m


def _dqn_kernel(x_ref, w1_ref, b1_ref, w2_ref, b2_ref, w3_ref, b3_ref, o_ref):
    # Layer 1: [TB, 112] @ [112, 128] on the MXU, f32 accumulation.
    h1 = jnp.dot(x_ref[...], w1_ref[...], preferred_element_type=jnp.float32)
    h1 = jnp.maximum(h1 + b1_ref[...], 0.0)          # bias + ReLU in f32 (VPU)
    # Layer 2: cast activations to the weight dtype for the MXU, accumulate f32.
    h2 = jnp.dot(h1.astype(w2_ref.dtype), w2_ref[...],
                 preferred_element_type=jnp.float32)
    h2 = jnp.maximum(h2 + b2_ref[...], 0.0)
    # Output layer (no activation); lane-dense [TB, 128] store.
    out = jnp.dot(h2.astype(w3_ref.dtype), w3_ref[...],
                  preferred_element_type=jnp.float32)
    o_ref[...] = (out + b3_ref[...]).astype(o_ref.dtype)


def _pad_params(params, stream_dtype):
    """Zero-pad logical params to lane-dense shapes; weights -> stream_dtype,
    biases stay f32 (added post-matmul in f32)."""
    w1, b1, w2, b2, w3, b3 = params

    def pad2(a, rows, cols):
        return jnp.pad(a, ((0, rows - a.shape[0]), (0, cols - a.shape[1])))

    w1p = pad2(w1, INPUT_SIZE, H_PAD).astype(stream_dtype)
    b1p = pad2(b1, 1, H_PAD).astype(jnp.float32)
    w2p = pad2(w2, H_PAD, H_PAD).astype(stream_dtype)
    b2p = pad2(b2, 1, H_PAD).astype(jnp.float32)
    w3p = pad2(w3, H_PAD, OUT_PAD).astype(stream_dtype)
    b3p = pad2(b3, 1, OUT_PAD).astype(jnp.float32)
    return w1p, b1p, w2p, b2p, w3p, b3p


@partial(jax.jit, static_argnames=("block_b", "stream_dtype"))
def dqn_forward(x, params, block_b=512, stream_dtype=jnp.bfloat16):
    """x: [B, INPUT_SIZE] float32 -> [B, N_ACTIONS] float32 (Q-values)."""
    B = x.shape[0]
    # Batch tile: multiple of 8 (sublane), capped so tiny batches don't over-pad.
    TB = min(block_b, _round_up(B, 8))
    Bp = pl.cdiv(B, TB) * TB

    x_s = x.astype(stream_dtype)
    if Bp != B:
        x_s = jnp.pad(x_s, ((0, Bp - B), (0, 0)))

    w1p, b1p, w2p, b2p, w3p, b3p = _pad_params(params, stream_dtype)

    padded = (w1p, b1p, w2p, b2p, w3p, b3p)
    param_bytes = sum(int(p.size) * p.dtype.itemsize for p in padded)
    flops = 2 * Bp * (INPUT_SIZE * H_PAD + H_PAD * H_PAD + H_PAD * OUT_PAD)
    bytes_accessed = (Bp * INPUT_SIZE * x_s.dtype.itemsize
                      + Bp * OUT_PAD * 4
                      + param_bytes)

    grid = (Bp // TB,)
    out_padded = pl.pallas_call(
        _dqn_kernel,
        out_shape=jax.ShapeDtypeStruct((Bp, OUT_PAD), jnp.float32),
        grid_spec=pltpu.PrefetchScalarGridSpec(
            num_scalar_prefetch=0,
            grid=grid,
            in_specs=[
                # Streamed per-tile input (pipelined / double-buffered by Pallas).
                pl.BlockSpec((TB, INPUT_SIZE), lambda i: (i, 0)),
                # Weights & biases: VMEM-resident across all grid steps.
                pl.BlockSpec((INPUT_SIZE, H_PAD), lambda i: (0, 0)),
                pl.BlockSpec((1, H_PAD), lambda i: (0, 0)),
                pl.BlockSpec((H_PAD, H_PAD), lambda i: (0, 0)),
                pl.BlockSpec((1, H_PAD), lambda i: (0, 0)),
                pl.BlockSpec((H_PAD, OUT_PAD), lambda i: (0, 0)),
                pl.BlockSpec((1, OUT_PAD), lambda i: (0, 0)),
            ],
            out_specs=pl.BlockSpec((TB, OUT_PAD), lambda i: (i, 0)),
        ),
        compiler_params=pltpu.CompilerParams(
            dimension_semantics=("parallel",),   # shard batch tiles across v7x TCs
        ),
        cost_estimate=pl.CostEstimate(
            flops=flops, transcendentals=0, bytes_accessed=bytes_accessed),
    )(x_s, w1p, b1p, w2p, b2p, w3p, b3p)

    return out_padded[:B, :N_ACTIONS]


def init_dqn_params(key):
    """Deterministic init mirroring PyTorch nn.Linear default
    (U[-1/sqrt(fan_in), 1/sqrt(fan_in)]).  Weights stored transposed: [in, out]."""
    def linear(key, fan_in, fan_out):
        kw, kb = jax.random.split(key)
        bound = 1.0 / jnp.sqrt(jnp.float32(fan_in))
        w = jax.random.uniform(kw, (fan_in, fan_out), jnp.float32, -bound, bound)
        b = jax.random.uniform(kb, (1, fan_out), jnp.float32, -bound, bound)
        return w, b

    k1, k2, k3 = jax.random.split(key, 3)
    w1, b1 = linear(k1, INPUT_SIZE, HIDDEN1)
    w2, b2 = linear(k2, HIDDEN1, HIDDEN2)
    w3, b3 = linear(k3, HIDDEN2, N_ACTIONS)
    return (w1, b1, w2, b2, w3, b3)


def dqn_reference(x, params):
    """Pure-JAX f32 reference (exact PyTorch forward semantics)."""
    w1, b1, w2, b2, w3, b3 = params
    h1 = jnp.maximum(x @ w1 + b1, 0.0)
    h2 = jnp.maximum(h1 @ w2 + b2, 0.0)
    return h2 @ w3 + b3


def dqn_reference_cast(x, params, dtype):
    """Reference mirroring the kernel's bf16-operand / f32-accumulate math."""
    w1, b1, w2, b2, w3, b3 = params
    f32 = jnp.float32
    q = lambda a: a.astype(dtype).astype(f32)
    h1 = jnp.maximum(q(x) @ q(w1) + b1, 0.0)
    h2 = jnp.maximum(q(h1) @ q(w2) + b2, 0.0)
    return q(h2) @ q(w3) + b3


if __name__ == "__main__":
    key = jax.random.PRNGKey(0)
    k_params, k_x = jax.random.split(key)

    params = init_dqn_params(k_params)

    batch = 2
    x = jax.random.normal(k_x, (batch, INPUT_SIZE), dtype=jnp.float32)

    out = dqn_forward(x, params)
    out = jax.block_until_ready(out)
    assert out.shape == (batch, N_ACTIONS)

    # Tight check vs. a reference that mirrors the kernel's bf16 operand casts.
    ref_cast = dqn_reference_cast(x, params, jnp.bfloat16)
    assert jnp.allclose(out, ref_cast, atol=5e-3, rtol=5e-3), \
        "mismatch vs bf16-matched reference"

    # Looser check vs. the pure-f32 PyTorch-equivalent forward.
    ref_f32 = dqn_reference(x, params)
    assert jnp.allclose(out, ref_f32, atol=5e-2, rtol=5e-2), \
        "mismatch vs f32 reference"

    print("KERNEL_OK")
</pallas_src>

<mosaic_0001>
module attributes {stable_mosaic.version = 11 : i64} {
  func.func @_dqn_kernel(%arg0: i32, %arg1: memref<8x112xbf16, #tpu.memory_space<vmem>>, %arg2: memref<112x128xbf16, #tpu.memory_space<vmem>>, %arg3: memref<1x128xf32, #tpu.memory_space<vmem>>, %arg4: memref<128x128xbf16, #tpu.memory_space<vmem>>, %arg5: memref<1x128xf32, #tpu.memory_space<vmem>>, %arg6: memref<128x128xbf16, #tpu.memory_space<vmem>>, %arg7: memref<1x128xf32, #tpu.memory_space<vmem>>, %arg8: memref<8x128xf32, #tpu.memory_space<vmem>>) attributes {dimension_semantics = [#tpu.dimension_semantics<parallel>], iteration_bounds = array<i64: 1>, scalar_prefetch = 0 : i64, scratch_operands = 0 : i64, tpu.core_type = #tpu.core_type<tc>, window_params = [{transform_indices = @transform_0, window_bounds = array<i64: 8, 112>}, {pipeline_mode = #tpu.pipeline_mode<synchronous>, transform_indices = @transform_1, window_bounds = array<i64: 112, 128>}, {pipeline_mode = #tpu.pipeline_mode<synchronous>, transform_indices = @transform_2, window_bounds = array<i64: 1, 128>}, {pipeline_mode = #tpu.pipeline_mode<synchronous>, transform_indices = @transform_3, window_bounds = array<i64: 128, 128>}, {pipeline_mode = #tpu.pipeline_mode<synchronous>, transform_indices = @transform_4, window_bounds = array<i64: 1, 128>}, {pipeline_mode = #tpu.pipeline_mode<synchronous>, transform_indices = @transform_5, window_bounds = array<i64: 128, 128>}, {pipeline_mode = #tpu.pipeline_mode<synchronous>, transform_indices = @transform_6, window_bounds = array<i64: 1, 128>}, {transform_indices = @transform_7, window_bounds = array<i64: 8, 128>}]} {
    %c0 = arith.constant 0 : index
    %c0_0 = arith.constant 0 : index
    %0 = vector.load %arg1[%c0, %c0_0] : memref<8x112xbf16, #tpu.memory_space<vmem>>, vector<8x112xbf16>
    %c0_1 = arith.constant 0 : index
    %c0_2 = arith.constant 0 : index
    %1 = vector.load %arg2[%c0_1, %c0_2] : memref<112x128xbf16, #tpu.memory_space<vmem>>, vector<112x128xbf16>
    %cst = arith.constant dense<0.000000e+00> : vector<8x128xf32>
    %2 = tpu.matmul %0, %1, %cst {dimension_numbers = #tpu.dot_dimension_numbers<[1], [0], [0], [1], [0, 0, 1, 1], [], []>} : vector<8x112xbf16>, vector<112x128xbf16>, vector<8x128xf32> -> vector<8x128xf32>
    %c0_3 = arith.constant 0 : index
    %c0_4 = arith.constant 0 : index
    %3 = vector.load %arg3[%c0_3, %c0_4] : memref<1x128xf32, #tpu.memory_space<vmem>>, vector<1x128xf32>
    %4 = vector.broadcast %3 : vector<1x128xf32> to vector<8x128xf32>
    %5 = arith.addf %2, %4 : vector<8x128xf32>
    %cst_5 = arith.constant 0.000000e+00 : f32
    %6 = vector.broadcast %cst_5 : f32 to vector<8x128xf32>
    %7 = arith.maximumf %5, %6 : vector<8x128xf32>
    %8 = arith.truncf %7 : vector<8x128xf32> to vector<8x128xbf16>
    %c0_6 = arith.constant 0 : index
    %c0_7 = arith.constant 0 : index
    %9 = vector.load %arg4[%c0_6, %c0_7] : memref<128x128xbf16, #tpu.memory_space<vmem>>, vector<128x128xbf16>
    %cst_8 = arith.constant dense<0.000000e+00> : vector<8x128xf32>
    %10 = tpu.matmul %8, %9, %cst_8 {dimension_numbers = #tpu.dot_dimension_numbers<[1], [0], [0], [1], [0, 0, 1, 1], [], []>} : vector<8x128xbf16>, vector<128x128xbf16>, vector<8x128xf32> -> vector<8x128xf32>
    %c0_9 = arith.constant 0 : index
    %c0_10 = arith.constant 0 : index
    %11 = vector.load %arg5[%c0_9, %c0_10] : memref<1x128xf32, #tpu.memory_space<vmem>>, vector<1x128xf32>
    %12 = vector.broadcast %11 : vector<1x128xf32> to vector<8x128xf32>
    %13 = arith.addf %10, %12 : vector<8x128xf32>
    %cst_11 = arith.constant 0.000000e+00 : f32
    %14 = vector.broadcast %cst_11 : f32 to vector<8x128xf32>
    %15 = arith.maximumf %13, %14 : vector<8x128xf32>
    %16 = arith.truncf %15 : vector<8x128xf32> to vector<8x128xbf16>
    %c0_12 = arith.constant 0 : index
    %c0_13 = arith.constant 0 : index
    %17 = vector.load %arg6[%c0_12, %c0_13] : memref<128x128xbf16, #tpu.memory_space<vmem>>, vector<128x128xbf16>
    %cst_14 = arith.constant dense<0.000000e+00> : vector<8x128xf32>
    %18 = tpu.matmul %16, %17, %cst_14 {dimension_numbers = #tpu.dot_dimension_numbers<[1], [0], [0], [1], [0, 0, 1, 1], [], []>} : vector<8x128xbf16>, vector<128x128xbf16>, vector<8x128xf32> -> vector<8x128xf32>
    %c0_15 = arith.constant 0 : index
    %c0_16 = arith.constant 0 : index
    %19 = vector.load %arg7[%c0_15, %c0_16] : memref<1x128xf32, #tpu.memory_space<vmem>>, vector<1x128xf32>
    %20 = vector.broadcast %19 : vector<1x128xf32> to vector<8x128xf32>
    %21 = arith.addf %18, %20 : vector<8x128xf32>
    %c0_17 = arith.constant 0 : index
    %c0_18 = arith.constant 0 : index
    %22 = vector.load %arg8[%c0_17, %c0_18] : memref<8x128xf32, #tpu.memory_space<vmem>>, vector<8x128xf32>
    tpu.vector_store %arg8[%c0_17, %c0_18], %21 {strides = array<i32>} : memref<8x128xf32, #tpu.memory_space<vmem>>, vector<8x128xf32>,
    return
  }
  func.func @transform_0(%arg0: i32) -> (i32, i32) {
    %c0_i32 = arith.constant 0 : i32
    %c0_i32_0 = arith.constant 0 : i32
    return %arg0, %c0_i32 : i32, i32
  }
  func.func @transform_1(%arg0: i32) -> (i32, i32) {
    %c0_i32 = arith.constant 0 : i32
    %c0_i32_0 = arith.constant 0 : i32
    %c0_i32_1 = arith.constant 0 : i32
    return %c0_i32, %c0_i32_0 : i32, i32
  }
  func.func @transform_2(%arg0: i32) -> (i32, i32) {
    %c0_i32 = arith.constant 0 : i32
    %c0_i32_0 = arith.constant 0 : i32
    %c0_i32_1 = arith.constant 0 : i32
    return %c0_i32, %c0_i32_0 : i32, i32
  }
  func.func @transform_3(%arg0: i32) -> (i32, i32) {
    %c0_i32 = arith.constant 0 : i32
    %c0_i32_0 = arith.constant 0 : i32
    %c0_i32_1 = arith.constant 0 : i32
    return %c0_i32, %c0_i32_0 : i32, i32
  }
  func.func @transform_4(%arg0: i32) -> (i32, i32) {
    %c0_i32 = arith.constant 0 : i32
    %c0_i32_0 = arith.constant 0 : i32
    %c0_i32_1 = arith.constant 0 : i32
    return %c0_i32, %c0_i32_0 : i32, i32
  }
  func.func @transform_5(%arg0: i32) -> (i32, i32) {
    %c0_i32 = arith.constant 0 : i32
    %c0_i32_0 = arith.constant 0 : i32
    %c0_i32_1 = arith.constant 0 : i32
    return %c0_i32, %c0_i32_0 : i32, i32
  }
  func.func @transform_6(%arg0: i32) -> (i32, i32) {
    %c0_i32 = arith.constant 0 : i32
    %c0_i32_0 = arith.constant 0 : i32
    %c0_i32_1 = arith.constant 0 : i32
    return %c0_i32, %c0_i32_0 : i32, i32
  }
  func.func @transform_7(%arg0: i32) -> (i32, i32) {
    %c0_i32 = arith.constant 0 : i32
    %c0_i32_0 = arith.constant 0 : i32
    return %arg0, %c0_i32 : i32, i32
  }
}

</mosaic_0001>

<bundles_post_ra>
// kernel: dqn_forward.1
= control target key start
LH: loop header
LB: loop body
LE: loop exit
PB: predicated region body
PF: predicated region fallthrough
CT: control target
= control target key end

     0   :  { %v502_v0 = vmov 0.0   ;;  %vm503_vm0 = vmmov 0   ;;  %vm91_vm1 = vcmask 916480   ;;  %s657_s1 = inlined_call_operand.vmem [shape: bf16[112,128], index: 1, kind: input, shape index: {}]   ;;  %s658_s3 = inlined_call_operand.vmem [shape: bf16[128,128], index: 3, kind: input, shape index: {}]   ;;  %s659_s0 = inlined_call_operand.vmem [shape: bf16[8,112], index: 0, kind: input, shape index: {}]   ;;  %s660_s5 = inlined_call_operand.vmem [shape: bf16[128,128], index: 5, kind: input, shape index: {}]   ;;  %s661_s2 = inlined_call_operand.vmem [shape: f32[1,128], index: 2, kind: input, shape index: {}]   ;;  %s662_s4 = inlined_call_operand.vmem [shape: f32[1,128], index: 4, kind: input, shape index: {}]   ;;  %s663_s6 = inlined_call_operand.vmem [shape: f32[1,128], index: 6, kind: input, shape index: {}]   ;;  %s664_s7 = inlined_call_operand.vmem [shape: f32[8,128], index: 7, kind: output, shape index: {}]  }
   0x1   :  { %419 = vmatprep.subr.bf16.mxu0 %v502_v0  ;;  %v479_v1 = vld [vmem:[%s657_s1] sm:$0xff]   ;;  %433 = vmatprep.mubr.msk.bf16.mxu0 %vm503_vm0, %v502_v0  ;;  %v480_v2 = vld [vmem:[%s657_s1 + $0x8] sm:$0xff]   ;;  %v481_v3 = vld [vmem:[%s657_s1 + $0x10] sm:$0xff]  }
   0x2   :  { %437 = vmatprep.subr.bf16.mxu1 %v502_v0  ;;  %453 = vmatprep.mubr.msk.bf16.mxu1 %vm503_vm0, %v502_v0  ;;  %v486_v4 = vld [vmem:[%s658_s3] sm:$0xff]   ;;  %v482_v5 = vld [vmem:[%s657_s1 + $0x18] sm:$0xff]   ;;  %v487_v6 = vld [vmem:[%s658_s3 + $0x8] sm:$0xff]  }
   0x3   :  { %420 = vmatpush3.bf16.msra.mxu0 %v479_v1  ;;  %438 = vmatpush3.bf16.msra.mxu1 %v486_v4  ;;  %v483_v7 = vld [vmem:[%s657_s1 + $0x20] sm:$0xff]   ;;  %v488_v8 = vld [vmem:[%s658_s3 + $0x10] sm:$0xff]   ;;  %v484_v9 = vld [vmem:[%s657_s1 + $0x28] sm:$0xff]  }
   0x4   :  { %421 = vmatprep.subr.bf16.mxu0 %v502_v0  ;;  %439 = vmatprep.subr.bf16.mxu1 %v502_v0  ;;  %v489_v10 = vld [vmem:[%s658_s3 + $0x18] sm:$0xff]   ;;  %v485_v11 = vld [vmem:[%s657_s1 + $0x30] sm:$0xff]   ;;  %v490_v12 = vld [vmem:[%s658_s3 + $0x20] sm:$0xff]  }
   0x5   :  { %v27_v13 = vld [vmem:[%s659_s0] sm:$0xf]  ;;  %v491_v14 = vld [vmem:[%s658_s3 + $0x28] sm:$0xff]   ;;  %v492_v15 = vld [vmem:[%s658_s3 + $0x30] sm:$0xff]  }
   0x6   :  { %v493_v16 = vld [vmem:[%s658_s3 + $0x38] sm:$0xff]   ;;  %v494_v17 = vld [vmem:[%s660_s5] sm:$0xff]   ;;  %v495_v18 = vld [vmem:[%s660_s5 + $0x8] sm:$0xff]  }
   0x7   :  { %422 = vmatpush3.bf16.msra.mxu0 %v480_v2  ;;  %440 = vmatpush3.bf16.msra.mxu1 %v487_v6  ;;  %v496_v19 = vld [vmem:[%s660_s5 + $0x10] sm:$0xff]   ;;  %v497_v20 = vld [vmem:[%s660_s5 + $0x18] sm:$0xff]   ;;  %v498_v21 = vld [vmem:[%s660_s5 + $0x20] sm:$0xff]  }
   0x8   :  { %423 = vmatprep.subr.bf16.mxu0 %v502_v0  ;;  %441 = vmatprep.subr.bf16.mxu1 %v502_v0  ;;  %v499_v22 = vld [vmem:[%s660_s5 + $0x28] sm:$0xff]   ;;  %v366_v23 = vld [vmem:[%s661_s2] ss:$0 sm:$0xff]  ;;  %v500_v31 = vld [vmem:[%s660_s5 + $0x30] sm:$0xff]  }
   0x9   :  { %v501_v32 = vld [vmem:[%s660_s5 + $0x38] sm:$0xff]   ;;  %v375_v33 = vld [vmem:[%s662_s4] ss:$0 sm:$0xff] }
   0xa   :  { %v384_v41 = vld [vmem:[%s663_s6] ss:$0 sm:$0xff] }
   0xb   :  { %424 = vmatpush3.bf16.msra.mxu0 %v481_v3  ;;  %442 = vmatpush3.bf16.msra.mxu1 %v488_v8 }
   0xc   :  { %425 = vmatprep.subr.bf16.mxu0 %v502_v0  ;;  %443 = vmatprep.subr.bf16.mxu1 %v502_v0 }
   0xf   :  { %426 = vmatpush3.bf16.msra.mxu0 %v482_v5  ;;  %444 = vmatpush3.bf16.msra.mxu1 %v489_v10 }
  0x10   :  { %427 = vmatprep.subr.bf16.mxu0 %v502_v0  ;;  %445 = vmatprep.subr.bf16.mxu1 %v502_v0 }
  0x13   :  { %428 = vmatpush3.bf16.msra.mxu0 %v483_v7  ;;  %446 = vmatpush3.bf16.msra.mxu1 %v490_v12 }
  0x14   :  { %429 = vmatprep.subr.bf16.mxu0 %v502_v0  ;;  %447 = vmatprep.subr.bf16.mxu1 %v502_v0 }
  0x17   :  { %430 = vmatpush3.bf16.msra.mxu0 %v484_v9  ;;  %448 = vmatpush3.bf16.msra.mxu1 %v491_v14 }
  0x18   :  { %431 = vmatprep.subr.bf16.mxu0 %v502_v0  ;;  %449 = vmatprep.subr.bf16.mxu1 %v502_v0 }
  0x1b   :  { %432 = vmatpush3.bf16.msra.mxu0 %v485_v11  ;;  %450 = vmatpush3.bf16.msra.mxu1 %v492_v15 }
  0x1c   :  { %457 = vmatprep.subr.bf16.mxu0 %v502_v0  ;;  %451 = vmatprep.subr.bf16.mxu1 %v502_v0 }
  0x1e   :  { %434 = vmatmul.mubr.msk.bf16.vlgmr.msra.gmra.mrb[0].mxu0 %vm91_vm1, %v27_v13 }
  0x1f   :  { %473 = vmatprep.mubr.msk.bf16.mxu0 %vm503_vm0, %v502_v0  ;;  %452 = vmatpush3.bf16.msra.mxu1 %v493_v16 }
  0x20   :  { %458 = vmatpush3.bf16.msra.mxu0 %v494_v17 }
  0x21   :  { %459 = vmatprep.subr.bf16.mxu0 %v502_v0 }
  0x24   :  { %460 = vmatpush3.bf16.msra.mxu0 %v495_v18 }
  0x25   :  { %461 = vmatprep.subr.bf16.mxu0 %v502_v0 }
  0x28   :  { %462 = vmatpush3.bf16.msra.mxu0 %v496_v19 }
  0x29   :  { %463 = vmatprep.subr.bf16.mxu0 %v502_v0 }
  0x2c   :  { %464 = vmatpush3.bf16.msra.mxu0 %v497_v20 }
  0x2d   :  { %465 = vmatprep.subr.bf16.mxu0 %v502_v0 }
  0x30   :  { %466 = vmatpush3.bf16.msra.mxu0 %v498_v21 }
  0x31   :  { %467 = vmatprep.subr.bf16.mxu0 %v502_v0 }
  0x34   :  { %468 = vmatpush3.bf16.msra.mxu0 %v499_v22 }
  0x35   :  { %469 = vmatprep.subr.bf16.mxu0 %v502_v0 }
  0x38   :  { %470 = vmatpush3.bf16.msra.mxu0 %v500_v31 }
  0x39   :  { %471 = vmatprep.subr.bf16.mxu0 %v502_v0 }
  0x3c   :  { %472 = vmatpush3.bf16.msra.mxu0 %v501_v32 }
  0xf1   :  { %v129_v24 = vpop.f32.mrb[0].mxu0 }
  0xf2   :  { %v130_v25 = vadd.f32 %v366_v23, %v129_v24  ;;  %v435_v26 = vpop.f32.mrb[1].mxu0 }
  0xf3   :  { %v132_v27 = vpop.f32.mrb[2].mxu0 }
  0xf4   :  { %v135_v28 = vmax.f32 %v130_v25, 0.0  ;;  %v436_v29 = vpop.f32.mrb[3].mxu0 }
  0xf6   :  { %v136_v30 = vpack.c.bf16 %v135_v28, %v135_v28 }
  0xf8   :  { %454 = vmatmul.mubr.bf16.vlgmr.msra.gmra.mrb[0].mxu1 %v136_v30 }
 0x1cb   :  { %v242_v34 = vpop.f32.mrb[0].mxu1 }
 0x1cc   :  { %v243_v35 = vadd.f32 %v375_v33, %v242_v34  ;;  %v455_v36 = vpop.f32.mrb[1].mxu1 }
 0x1cd   :  { %v245_v37 = vpop.f32.mrb[2].mxu1 }
 0x1ce   :  { %v248_v38 = vmax.f32 %v243_v35, 0.0  ;;  %v456_v39 = vpop.f32.mrb[3].mxu1 }
 0x1d0   :  { %v249_v40 = vpack.c.bf16 %v248_v38, %v248_v38 }
 0x1d2   :  { %474 = vmatmul.mubr.bf16.vlgmr.msra.gmra.mrb[4].mxu0 %v249_v40 }
 0x2a5   :  { %v355_v42 = vpop.f32.mrb[4].mxu0 }
 0x2a6   :  { %v356_v43 = vadd.f32 %v384_v41, %v355_v42  ;;  %v475_v44 = vpop.f32.mrb[5].mxu0 }
 0x2a7   :  { %v358_v45 = vpop.f32.mrb[6].mxu0 }
 0x2a8   :  { %361 = vst [vmem:[%s664_s7] sm:$0xff] %v356_v43  ;;  %v476_v46 = vpop.f32.mrb[7].mxu0 }

</bundles_post_ra>
